<compile_context>
chip_gen: v5e
topology: v5e:2x2
jax: 0.10.0
libtpu: 0.0.40
codegen_flags: <defaults>
</compile_context>

<pallas_src>
import functools

import jax
import jax.numpy as jnp
from jax.experimental import pallas as pl
from jax.experimental.pallas import tpu as pltpu


OUT_PAD = 128          # lane-dense padded output width (real outputs = 10)
NEG_BIG = -1e30        # bias padding value -> exp() underflows to exactly 0 (f32)


def _round_up(x, m):
    return ((x + m - 1) // m) * m


def _choose_tile_b(batch):
    """Pick the batch tile.

    Big enough to amortize the ~0.35 us per-grid-step overhead, small enough
    that batches >= 256 get at least 2 grid steps (v7x has 2 TensorCores and
    the batch axis is marked "parallel").
    """
    if batch <= 128:
        return max(8, _round_up(batch, 8))            # single (possibly partial) tile
    return min(512, _round_up(pl.cdiv(batch, 2), 128))


def mlp_kernel(x_ref, w1_ref, b1_ref, w2_ref, b2_ref, w3_ref, b3_ref, o_ref):
    """One (TILE_B, :) batch tile of the fused 3-layer MLP + softmax."""
    # x streams in as f32 and is cast to bf16 in-register (no extra HBM pass).
    x = x_ref[...].astype(jnp.bfloat16)                           # (TILE_B, 784)

    # Layer 1: (TILE_B,784) @ (784,256) + b1 -> ReLU   (f32 accumulation on MXU)
    h1 = jnp.dot(x, w1_ref[...], preferred_element_type=jnp.float32) + b1_ref[...]
    h1 = jnp.maximum(h1, 0.0)

    # Layer 2: (TILE_B,256) @ (256,256) + b2 -> ReLU
    h2 = jnp.dot(h1.astype(jnp.bfloat16), w2_ref[...],
                 preferred_element_type=jnp.float32) + b2_ref[...]
    h2 = jnp.maximum(h2, 0.0)

    # Layer 3 (lane-dense, padded to 128 outputs): (TILE_B,256) @ (256,128) + b3
    logits = jnp.dot(h2.astype(jnp.bfloat16), w3_ref[...],
                     preferred_element_type=jnp.float32) + b3_ref[...]

    # Numerically stable softmax over the 128-lane slab. Padded columns carry
    # logits ~ -1e30, so exp() underflows to exactly 0 and they take no mass.
    # Exact divide keeps row sums at 1 to f32 precision (approx reciprocal
    # previously broke the row-sum tolerance).
    m = jnp.max(logits, axis=-1, keepdims=True)
    e = jnp.exp(logits - m)
    denom = jnp.sum(e, axis=-1, keepdims=True)
    o_ref[...] = (e / denom).astype(o_ref.dtype)


def prepare_params(params):
    """One-time weight prep: cast matmul weights to bf16, pad layer 3 to 128
    lanes, fill the padded bias lanes with -1e30. Kept OUT of the per-call
    path so inference never re-pads / re-casts weights in HBM."""
    w1, b1, w2, b2, w3, b3 = params
    H2, OUT = w3.shape
    w3p = jnp.zeros((H2, OUT_PAD), jnp.bfloat16).at[:, :OUT].set(w3.astype(jnp.bfloat16))
    b3p = jnp.full((1, OUT_PAD), NEG_BIG, jnp.float32).at[:, :OUT].set(
        b3.reshape(1, OUT).astype(jnp.float32))
    return (w1.astype(jnp.bfloat16), b1.reshape(1, -1).astype(jnp.float32),
            w2.astype(jnp.bfloat16), b2.reshape(1, -1).astype(jnp.float32),
            w3p, b3p)


@functools.partial(jax.jit, static_argnames=("out_dims",))
def mlp_forward(x, prepared_params, out_dims=10):
    """x: (B, 784) float32. prepared_params: output of prepare_params()."""
    w1, b1, w2, b2, w3, b3 = prepared_params
    B, K = x.shape                      # K = 784
    H1 = w1.shape[1]                    # 256
    H2 = w2.shape[1]                    # 256

    tile_b = _choose_tile_b(B)
    num_tiles = pl.cdiv(B, tile_b)      # ragged last tile handled by Mosaic masking
    b_total = num_tiles * tile_b

    # Advisory cost estimate so XLA can schedule/overlap this call.
    flops = 2 * b_total * (K * H1 + H1 * H2 + H2 * OUT_PAD)
    bytes_accessed = (
        B * K * 4                                    # x (f32, read once)
        + w1.size * 2 + w2.size * 2 + w3.size * 2    # bf16 weights
        + b1.size * 4 + b2.size * 4 + b3.size * 4    # f32 biases
        + B * OUT_PAD * 4                            # output
    )
    cost = pl.CostEstimate(
        flops=flops,
        transcendentals=b_total * OUT_PAD,
        bytes_accessed=bytes_accessed,
    )

    out_pad = pl.pallas_call(
        mlp_kernel,
        out_shape=jax.ShapeDtypeStruct((B, OUT_PAD), jnp.float32),
        grid=(num_tiles,),
        in_specs=[
            pl.BlockSpec((tile_b, K), lambda i: (i, 0)),     # x tile (streamed, full-K block)
            pl.BlockSpec((K, H1), lambda i: (0, 0)),         # w1 (VMEM-resident across grid)
            pl.BlockSpec((1, H1), lambda i: (0, 0)),         # b1
            pl.BlockSpec((H1, H2), lambda i: (0, 0)),        # w2
            pl.BlockSpec((1, H2), lambda i: (0, 0)),         # b2
            pl.BlockSpec((H2, OUT_PAD), lambda i: (0, 0)),   # w3 (lane-dense)
            pl.BlockSpec((1, OUT_PAD), lambda i: (0, 0)),    # b3 (-1e30 padded lanes)
        ],
        out_specs=pl.BlockSpec((tile_b, OUT_PAD), lambda i: (i, 0)),
        compiler_params=pltpu.CompilerParams(
            dimension_semantics=("parallel",),
            vmem_limit_bytes=32 << 20,
        ),
        cost_estimate=cost,
    )(x, w1, b1, w2, b2, w3, b3)

    # Strip the 118 padded output lanes (exactly zero probability mass).
    return out_pad[:, :out_dims]


def init_params(key, input_dims=784, fc1_dims=256, fc2_dims=256, output_dims=10):
    """Deterministic init mirroring nn.Linear's U(-1/sqrt(fan_in), 1/sqrt(fan_in))."""
    ks = jax.random.split(key, 6)

    def linear(kw, kb, fan_in, fan_out):
        bound = 1.0 / jnp.sqrt(fan_in)
        w = jax.random.uniform(kw, (fan_in, fan_out), jnp.float32, -bound, bound)
        b = jax.random.uniform(kb, (1, fan_out), jnp.float32, -bound, bound)
        return w, b

    w1, b1 = linear(ks[0], ks[1], input_dims, fc1_dims)
    w2, b2 = linear(ks[2], ks[3], fc1_dims, fc2_dims)
    w3, b3 = linear(ks[4], ks[5], fc2_dims, output_dims)
    return (w1, b1, w2, b2, w3, b3)


def mlp_reference(x, params):
    """Pure-JAX f32 reference (for correctness check)."""
    w1, b1, w2, b2, w3, b3 = params
    h1 = jnp.maximum(x @ w1 + b1, 0.0)
    h2 = jnp.maximum(h1 @ w2 + b2, 0.0)
    logits = h2 @ w3 + b3
    return jax.nn.softmax(logits, axis=-1)


if __name__ == "__main__":
    key = jax.random.PRNGKey(0)
    k_params, k_x = jax.random.split(key)

    # Module-implied sizes: input_dims=784, fc1=fc2=256, output=10. Small batch
    # (single grid step here; larger batches tile across the "parallel" grid).
    B = 8
    params = init_params(k_params)
    prepared = prepare_params(params)      # one-time weight prep (bf16 + pad)
    x = jax.random.normal(k_x, (B, 784), dtype=jnp.float32)

    probs = mlp_forward(x, prepared)
    probs = jax.block_until_ready(probs)

    # Sanity: output shape, rows sum to 1 (softmax), and agreement with the
    # f32 reference within bf16-matmul tolerance.
    assert probs.shape == (B, 10)
    row_sums = jnp.sum(probs, axis=-1)
    assert jnp.allclose(row_sums, 1.0, atol=2e-3), float(jnp.max(jnp.abs(row_sums - 1.0)))
    ref = mlp_reference(x, params)
    assert jnp.allclose(probs, ref, atol=5e-2), float(jnp.max(jnp.abs(probs - ref)))

    # TODO(synk): Categorical(dist) wrapping (sampling/log_prob) is distribution
    # bookkeeping, not kernel compute; the kernel returns the probability tensor.
    print("KERNEL_OK")
</pallas_src>

<mosaic_0001>
module attributes {stable_mosaic.version = 11 : i64} {
  func.func @mlp_kernel(%arg0: i32, %arg1: memref<8x784xf32, #tpu.memory_space<vmem>>, %arg2: memref<784x256xbf16, #tpu.memory_space<vmem>>, %arg3: memref<1x256xf32, #tpu.memory_space<vmem>>, %arg4: memref<256x256xbf16, #tpu.memory_space<vmem>>, %arg5: memref<1x256xf32, #tpu.memory_space<vmem>>, %arg6: memref<256x128xbf16, #tpu.memory_space<vmem>>, %arg7: memref<1x128xf32, #tpu.memory_space<vmem>>, %arg8: memref<8x128xf32, #tpu.memory_space<vmem>>) attributes {dimension_semantics = [#tpu.dimension_semantics<parallel>], iteration_bounds = array<i64: 1>, scalar_prefetch = 0 : i64, scratch_operands = 0 : i64, tpu.core_type = #tpu.core_type<tc>, window_params = [{transform_indices = @transform_0, window_bounds = array<i64: 8, 784>}, {pipeline_mode = #tpu.pipeline_mode<synchronous>, transform_indices = @transform_1, window_bounds = array<i64: 784, 256>}, {pipeline_mode = #tpu.pipeline_mode<synchronous>, transform_indices = @transform_2, window_bounds = array<i64: 1, 256>}, {pipeline_mode = #tpu.pipeline_mode<synchronous>, transform_indices = @transform_3, window_bounds = array<i64: 256, 256>}, {pipeline_mode = #tpu.pipeline_mode<synchronous>, transform_indices = @transform_4, window_bounds = array<i64: 1, 256>}, {pipeline_mode = #tpu.pipeline_mode<synchronous>, transform_indices = @transform_5, window_bounds = array<i64: 256, 128>}, {pipeline_mode = #tpu.pipeline_mode<synchronous>, transform_indices = @transform_6, window_bounds = array<i64: 1, 128>}, {transform_indices = @transform_7, window_bounds = array<i64: 8, 128>}]} {
    %c0 = arith.constant 0 : index
    %c0_0 = arith.constant 0 : index
    %0 = vector.load %arg1[%c0, %c0_0] : memref<8x784xf32, #tpu.memory_space<vmem>>, vector<8x784xf32>
    %1 = arith.truncf %0 : vector<8x784xf32> to vector<8x784xbf16>
    %c0_1 = arith.constant 0 : index
    %c0_2 = arith.constant 0 : index
    %2 = vector.load %arg2[%c0_1, %c0_2] : memref<784x256xbf16, #tpu.memory_space<vmem>>, vector<784x256xbf16>
    %cst = arith.constant dense<0.000000e+00> : vector<8x256xf32>
    %3 = tpu.matmul %1, %2, %cst {dimension_numbers = #tpu.dot_dimension_numbers<[1], [0], [0], [1], [0, 0, 1, 1], [], []>} : vector<8x784xbf16>, vector<784x256xbf16>, vector<8x256xf32> -> vector<8x256xf32>
    %c0_3 = arith.constant 0 : index
    %c0_4 = arith.constant 0 : index
    %4 = vector.load %arg3[%c0_3, %c0_4] : memref<1x256xf32, #tpu.memory_space<vmem>>, vector<1x256xf32>
    %5 = vector.broadcast %4 : vector<1x256xf32> to vector<8x256xf32>
    %6 = arith.addf %3, %5 : vector<8x256xf32>
    %cst_5 = arith.constant 0.000000e+00 : f32
    %7 = vector.broadcast %cst_5 : f32 to vector<8x256xf32>
    %8 = arith.maximumf %6, %7 : vector<8x256xf32>
    %9 = arith.truncf %8 : vector<8x256xf32> to vector<8x256xbf16>
    %c0_6 = arith.constant 0 : index
    %c0_7 = arith.constant 0 : index
    %10 = vector.load %arg4[%c0_6, %c0_7] : memref<256x256xbf16, #tpu.memory_space<vmem>>, vector<256x256xbf16>
    %cst_8 = arith.constant dense<0.000000e+00> : vector<8x256xf32>
    %11 = tpu.matmul %9, %10, %cst_8 {dimension_numbers = #tpu.dot_dimension_numbers<[1], [0], [0], [1], [0, 0, 1, 1], [], []>} : vector<8x256xbf16>, vector<256x256xbf16>, vector<8x256xf32> -> vector<8x256xf32>
    %c0_9 = arith.constant 0 : index
    %c0_10 = arith.constant 0 : index
    %12 = vector.load %arg5[%c0_9, %c0_10] : memref<1x256xf32, #tpu.memory_space<vmem>>, vector<1x256xf32>
    %13 = vector.broadcast %12 : vector<1x256xf32> to vector<8x256xf32>
    %14 = arith.addf %11, %13 : vector<8x256xf32>
    %cst_11 = arith.constant 0.000000e+00 : f32
    %15 = vector.broadcast %cst_11 : f32 to vector<8x256xf32>
    %16 = arith.maximumf %14, %15 : vector<8x256xf32>
    %17 = arith.truncf %16 : vector<8x256xf32> to vector<8x256xbf16>
    %c0_12 = arith.constant 0 : index
    %c0_13 = arith.constant 0 : index
    %18 = vector.load %arg6[%c0_12, %c0_13] : memref<256x128xbf16, #tpu.memory_space<vmem>>, vector<256x128xbf16>
    %cst_14 = arith.constant dense<0.000000e+00> : vector<8x128xf32>
    %19 = tpu.matmul %17, %18, %cst_14 {dimension_numbers = #tpu.dot_dimension_numbers<[1], [0], [0], [1], [0, 0, 1, 1], [], []>} : vector<8x256xbf16>, vector<256x128xbf16>, vector<8x128xf32> -> vector<8x128xf32>
    %c0_15 = arith.constant 0 : index
    %c0_16 = arith.constant 0 : index
    %20 = vector.load %arg7[%c0_15, %c0_16] : memref<1x128xf32, #tpu.memory_space<vmem>>, vector<1x128xf32>
    %21 = vector.broadcast %20 : vector<1x128xf32> to vector<8x128xf32>
    %22 = arith.addf %19, %21 : vector<8x128xf32>
    %cst_17 = arith.constant dense<0xFF800000> : vector<8xf32>
    %23 = vector.multi_reduction <maximumf>, %22, %cst_17 [1] : vector<8x128xf32> to vector<8xf32>
    %24 = vector.shape_cast %23 : vector<8xf32> to vector<8x1xf32>
    %25 = vector.broadcast %24 : vector<8x1xf32> to vector<8x128xf32>
    %26 = arith.subf %22, %25 : vector<8x128xf32>
    %27 = math.exp %26 : vector<8x128xf32>
    %cst_18 = arith.constant dense<0.000000e+00> : vector<8xf32>
    %28 = vector.multi_reduction <add>, %27, %cst_18 [1] : vector<8x128xf32> to vector<8xf32>
    %29 = vector.shape_cast %28 : vector<8xf32> to vector<8x1xf32>
    %30 = vector.broadcast %29 : vector<8x1xf32> to vector<8x128xf32>
    %31 = arith.divf %27, %30 : vector<8x128xf32>
    %c0_19 = arith.constant 0 : index
    %c0_20 = arith.constant 0 : index
    %32 = vector.load %arg8[%c0_19, %c0_20] : memref<8x128xf32, #tpu.memory_space<vmem>>, vector<8x128xf32>
    tpu.vector_store %arg8[%c0_19, %c0_20], %31 {strides = array<i32>} : memref<8x128xf32, #tpu.memory_space<vmem>>, vector<8x128xf32>,
    return
  }
  func.func @transform_0(%arg0: i32) -> (i32, i32) {
    %c0_i32 = arith.constant 0 : i32
    %c0_i32_0 = arith.constant 0 : i32
    return %arg0, %c0_i32 : i32, i32
  }
  func.func @transform_1(%arg0: i32) -> (i32, i32) {
    %c0_i32 = arith.constant 0 : i32
    %c0_i32_0 = arith.constant 0 : i32
    %c0_i32_1 = arith.constant 0 : i32
    return %c0_i32, %c0_i32_0 : i32, i32
  }
  func.func @transform_2(%arg0: i32) -> (i32, i32) {
    %c0_i32 = arith.constant 0 : i32
    %c0_i32_0 = arith.constant 0 : i32
    %c0_i32_1 = arith.constant 0 : i32
    return %c0_i32, %c0_i32_0 : i32, i32
  }
  func.func @transform_3(%arg0: i32) -> (i32, i32) {
    %c0_i32 = arith.constant 0 : i32
    %c0_i32_0 = arith.constant 0 : i32
    %c0_i32_1 = arith.constant 0 : i32
    return %c0_i32, %c0_i32_0 : i32, i32
  }
  func.func @transform_4(%arg0: i32) -> (i32, i32) {
    %c0_i32 = arith.constant 0 : i32
    %c0_i32_0 = arith.constant 0 : i32
    %c0_i32_1 = arith.constant 0 : i32
    return %c0_i32, %c0_i32_0 : i32, i32
  }
  func.func @transform_5(%arg0: i32) -> (i32, i32) {
    %c0_i32 = arith.constant 0 : i32
    %c0_i32_0 = arith.constant 0 : i32
    %c0_i32_1 = arith.constant 0 : i32
    return %c0_i32, %c0_i32_0 : i32, i32
  }
  func.func @transform_6(%arg0: i32) -> (i32, i32) {
    %c0_i32 = arith.constant 0 : i32
    %c0_i32_0 = arith.constant 0 : i32
    %c0_i32_1 = arith.constant 0 : i32
    return %c0_i32, %c0_i32_0 : i32, i32
  }
  func.func @transform_7(%arg0: i32) -> (i32, i32) {
    %c0_i32 = arith.constant 0 : i32
    %c0_i32_0 = arith.constant 0 : i32
    return %arg0, %c0_i32 : i32, i32
  }
}

</mosaic_0001>

<bundles_post_ra>
// kernel: mlp_forward.1
= control target key start
LH: loop header
LB: loop body
LE: loop exit
PB: predicated region body
PF: predicated region fallthrough
CT: control target
= control target key end

     0   :  { %12 = vsyncpa [#allocation3], 0  ;;  %s2361_s0 = inlined_call_operand.hbm [shape: f32[8,784], index: 0, kind: input, shape index: {}]   ;;  %s2362_s1 = inlined_call_operand.hbm [shape: bf16[784,256], index: 1, kind: input, shape index: {}]   ;;  %s2363_s2 = inlined_call_operand.hbm [shape: f32[1,256], index: 2, kind: input, shape index: {}]   ;;  %s2364_s3 = inlined_call_operand.hbm [shape: bf16[256,256], index: 3, kind: input, shape index: {}]   ;;  %s2365_s4 = inlined_call_operand.vmem [shape: f32[1,256], index: 4, kind: input, shape index: {}]   ;;  %s2366_s5 = inlined_call_operand.hbm [shape: bf16[256,128], index: 5, kind: input, shape index: {}]   ;;  %s2367_s6 = inlined_call_operand.vmem [shape: f32[1,128], index: 6, kind: input, shape index: {}]   ;;  %s2368_s7 = inlined_call_operand.hbm [shape: f32[8,128], index: 7, kind: output, shape index: {}]  }
   0x1   :  { %13 = vsyncpa [#allocation6], 0 }
   0x2   :  { %14 = vsyncpa [#allocation9], 0  ;;  %s31_s26 = sshll.u32 %s2362_s1, 4  ;;  %s32_s26 = int_to_ptr.hbm [resolvable:$true] %s31_s26 }
   0x3   :  { %15 = vsyncpa [#allocation4], 0  ;;  %s2253_s27 = smov [#allocation5]   ;;  %s55_s8 = sshll.u32 %s2364_s3, 4  ;;  %s56_s8 = int_to_ptr.hbm [resolvable:$true] %s55_s8 }
   0x4   :  { %s33_s28 = sshll.u32 %s2253_s27, 4  ;;  %s2254_s9 = smov 128   ;;  %s34_s28 = int_to_ptr.vmem [resolvable:$true] %s33_s28 }
   0x5   :  { %s2255_s10 = smov 8   ;;  %s2256_s11 = smov [#allocation8]  }
   0x6   :  { %39 = dma.hbm_to_vmem [thread:$0]  %s32_s26, 12544, %s34_s28, [#allocation6], %s2254_s9, %s2254_s9, %s2255_s10  }
   0x7   :  { %s57_s12 = sshll.u32 %s2256_s11, 4  ;;  %s21_s15 = sshll.u32 %s2361_s0, 4  ;;  %s58_s12 = int_to_ptr.vmem [resolvable:$true] %s57_s12  ;;  %s22_s15 = int_to_ptr.hbm [resolvable:$true] %s21_s15 }
   0x8   :  { %63 = dma.hbm_to_vmem [thread:$0]  %s56_s8, 4096, %s58_s12, [#allocation9], %s2254_s9, %s2254_s9, %s2255_s10  }
   0x9   :  { %s45_s17 = sshll.u32 %s2363_s2, 4  ;;  %s2257_s18 = smov [#allocation2]   ;;  %s46_s17 = int_to_ptr.hbm [resolvable:$true] %s45_s17 }
   0xa   :  { %s23_s19 = sshll.u32 %s2257_s18, 4  ;;  %s2258_s3 = smov [#allocation7]   ;;  %s24_s19 = int_to_ptr.vmem [resolvable:$true] %s23_s19 }
   0xb   :  { %26 = dma.hbm_to_vmem [thread:$0]  %s22_s15, 896, %s24_s19, [#allocation3]  }
   0xc   :  { %s47_s20 = sshll.u32 %s2258_s3, 4  ;;  %s70_s23 = sshll.u32 %s2366_s5, 4  ;;  %s48_s20 = int_to_ptr.vmem [resolvable:$true] %s47_s20  ;;  %s71_s23 = int_to_ptr.hbm [resolvable:$true] %s70_s23 }
   0xd   :  { %50 = dma.hbm_to_vmem [thread:$0]  %s46_s17, 32, %s48_s20, [#allocation6]  }
   0xe   :  { %s2259_s0 = smov [#allocation10]   ;;  %s2260_s25 = smov 64  }
   0xf   :  { %s72_s24 = sshll.u32 %s2259_s0, 4  ;;  %s2261_s26 = smov 4   ;;  %s73_s24 = int_to_ptr.vmem [resolvable:$true] %s72_s24 }
  0x10   :  { %78 = dma.hbm_to_vmem [thread:$0]  %s71_s23, 2048, %s73_s24, [#allocation9], %s2260_s25, %s2260_s25, %s2261_s26  }
  0x11   :  { %2245 = dma.done.wait [#allocation3], 896  }
  0x12   :  { %2246 = vsyncadd [#allocation3], 4294966400 }
  0x13   :  { %2247 = dma.done.wait [#allocation6], 12576  }
  0x14   :  { %2248 = vsyncadd [#allocation6], 4294954720 }
  0x15   :  { %2249 = dma.done.wait [#allocation9], 6144  }
  0x16   :  { %2250 = vsyncadd [#allocation9], 4294961152  ;;  %v1412_v0 = vld [vmem:[#allocation5 + $0x70] sm:$0xf]  ;;  %v1955_v1 = vld [vmem:[#allocation5 + $0x74] sm:$0xf0] }
  0x17   :  { %v1540_v2 = vld [vmem:[#allocation5 + $0x170] sm:$0xf]  ;;  %v1413_v3 = vor.u32 %v1955_v1, %v1412_v0  ;;  %v1987_v4 = vld [vmem:[#allocation5 + $0x174] sm:$0xf0]  ;;  %v1404_v11 = vld [vmem:[#allocation5 + $0x60] sm:$0xf] }
  0x18   :  { %v1604_v5 = vld [vmem:[#allocation5 + $0x1f0] sm:$0xf]  ;;  %v2003_v6 = vld [vmem:[#allocation5 + $0x1f4] sm:$0xf0]  ;;  %v1541_v7 = vor.u32 %v1987_v4, %v1540_v2  ;;  %v1953_v13 = vld [vmem:[#allocation5 + $0x64] sm:$0xf0] }
  0x19   :  { %v1605_v8 = vor.u32 %v2003_v6, %v1604_v5  ;;  %v1476_v9 = vld [vmem:[#allocation5 + $0xf0] sm:$0xf]  ;;  %v1971_v10 = vld [vmem:[#allocation5 + $0xf4] sm:$0xf0]  ;;  %714 = vmatpush.bf16.msra.mxu0 %v1413_v3  ;;  %v1532_v14 = vld [vmem:[#allocation5 + $0x160] sm:$0xf]  ;;  %v1405_v16 = vor.u32 %v1953_v13, %v1404_v11 }
  0x1a   :  { %v1477_v12 = vor.u32 %v1971_v10, %v1476_v9  ;;  %v1985_v15 = vld [vmem:[#allocation5 + $0x164] sm:$0xf0]  ;;  %740 = vmatpush.bf16.msra.mxu2 %v1541_v7  ;;  %v1596_v18 = vld [vmem:[#allocation5 + $0x1e0] sm:$0xf]  ;;  %v1396_v23 = vld [vmem:[#allocation5 + $0x50] sm:$0xf] }
  0x1b   :  { %753 = vmatpush.bf16.msra.mxu3 %v1605_v8  ;;  %v1533_v17 = vor.u32 %v1985_v15, %v1532_v14  ;;  %v2001_v19 = vld [vmem:[#allocation5 + $0x1e4] sm:$0xf0]  ;;  %v1468_v20 = vld [vmem:[#allocation5 + $0xe0] sm:$0xf]  ;;  %v1951_v24 = vld [vmem:[#allocation5 + $0x54] sm:$0xf0] }
  0x1c   :  { %727 = vmatpush.bf16.msra.mxu1 %v1477_v12  ;;  %v1597_v21 = vor.u32 %v2001_v19, %v1596_v18  ;;  %v1969_v22 = vld [vmem:[#allocation5 + $0xe4] sm:$0xf0]  ;;  %v1524_v26 = vld [vmem:[#allocation5 + $0x150] sm:$0xf]  ;;  %v1983_v27 = vld [vmem:[#allocation5 + $0x154] sm:$0xf0]  ;;  %v1397_v29 = vor.u32 %v1951_v24, %v1396_v23 }
  0x1d   :  { %v1469_v25 = vor.u32 %v1969_v22, %v1468_v20  ;;  %v1588_v28 = vld [vmem:[#allocation5 + $0x1d0] sm:$0xf]  ;;  %715 = vmatpush.bf16.msra.mxu0 %v1405_v16  ;;  %v1999_v30 = vld [vmem:[#allocation5 + $0x1d4] sm:$0xf0]  ;;  %v1525_v33 = vor.u32 %v1983_v27, %v1524_v26  ;;  %v1388_v35 = vld [vmem:[#allocation5 + $0x40] sm:$0xf] }
  0x1e   :  { %v1460_v31 = vld [vmem:[#allocation5 + $0xd0] sm:$0xf]  ;;  %v1967_v32 = vld [vmem:[#allocation5 + $0xd4] sm:$0xf0]  ;;  %741 = vmatpush.bf16.msra.mxu2 %v1533_v17  ;;  %v1589_v34 = vor.u32 %v1999_v30, %v1588_v28  ;;  %v1949_v36 = vld [vmem:[#allocation5 + $0x44] sm:$0xf0] }
  0x1f   :  { %754 = vmatpush.bf16.msra.mxu3 %v1597_v21  ;;  %v1516_v37 = vld [vmem:[#allocation5 + $0x140] sm:$0xf]  ;;  %v1461_v38 = vor.u32 %v1967_v32, %v1460_v31  ;;  %v1981_v39 = vld [vmem:[#allocation5 + $0x144] sm:$0xf0]  ;;  %v1389_v44 = vor.u32 %v1949_v36, %v1388_v35  ;;  %v1380_v47 = vld [vmem:[#allocation5 + $0x30] sm:$0xf] }
  0x20   :  { %728 = vmatpush.bf16.msra.mxu1 %v1469_v25  ;;  %v1580_v40 = vld [vmem:[#allocation5 + $0x1c0] sm:$0xf]  ;;  %v1997_v41 = vld [vmem:[#allocation5 + $0x1c4] sm:$0xf0]  ;;  %v1517_v45 = vor.u32 %v1981_v39, %v1516_v37  ;;  %v1947_v48 = vld [vmem:[#allocation5 + $0x34] sm:$0xf0] }
  0x21   :  { %v1452_v42 = vld [vmem:[#allocation5 + $0xc0] sm:$0xf]  ;;  %v1965_v43 = vld [vmem:[#allocation5 + $0xc4] sm:$0xf0]  ;;  %716 = vmatpush.bf16.msra.mxu0 %v1397_v29  ;;  %v1581_v46 = vor.u32 %v1997_v41, %v1580_v40  ;;  %v1508_v49 = vld [vmem:[#allocation5 + $0x130] sm:$0xf]  ;;  %v1381_v56 = vor.u32 %v1947_v48, %v1380_v47 }
  0x22   :  { %742 = vmatpush.bf16.msra.mxu2 %v1525_v33  ;;  %v1453_v50 = vor.u32 %v1965_v43, %v1452_v42  ;;  %v1979_v51 = vld [vmem:[#allocation5 + $0x134] sm:$0xf0]  ;;  %v1572_v52 = vld [vmem:[#allocation5 + $0x1b0] sm:$0xf]  ;;  %v1372_v59 = vld [vmem:[#allocation5 + $0x20] sm:$0xf] }
  0x23   :  { %755 = vmatpush.bf16.msra.mxu3 %v1589_v34  ;;  %v1995_v53 = vld [vmem:[#allocation5 + $0x1b4] sm:$0xf0]  ;;  %v1444_v54 = vld [vmem:[#allocation5 + $0xb0] sm:$0xf]  ;;  %v1509_v57 = vor.u32 %v1979_v51, %v1508_v49  ;;  %v1945_v60 = vld [vmem:[#allocation5 + $0x24] sm:$0xf0] }
  0x24   :  { %729 = vmatpush.bf16.msra.mxu1 %v1461_v38  ;;  %v1963_v55 = vld [vmem:[#allocation5 + $0xb4] sm:$0xf0]  ;;  %v1573_v58 = vor.u32 %v1995_v53, %v1572_v52  ;;  %v1500_v61 = vld [vmem:[#allocation5 + $0x120] sm:$0xf]  ;;  %v1977_v63 = vld [vmem:[#allocation5 + $0x124] sm:$0xf0]  ;;  %v1373_v4 = vor.u32 %v1945_v60, %v1372_v59 }
  0x25   :  { %717 = vmatpush.bf16.msra.mxu0 %v1389_v44  ;;  %v1445_v62 = vor.u32 %v1963_v55, %v1444_v54  ;;  %v1564_v0 = vld [vmem:[#allocation5 + $0x1a0] sm:$0xf]  ;;  %v1993_v1 = vld [vmem:[#allocation5 + $0x1a4] sm:$0xf0]  ;;  %v1501_v5 = vor.u32 %v1977_v63, %v1500_v61  ;;  %v1364_v7 = vld [vmem:[#allocation5 + $0x10] sm:$0xf] }
  0x26   :  { %743 = vmatpush.bf16.msra.mxu2 %v1517_v45  ;;  %v1436_v2 = vld [vmem:[#allocation5 + $0xa0] sm:$0xf]  ;;  %v1961_v3 = vld [vmem:[#allocation5 + $0xa4] sm:$0xf0]  ;;  %v1565_v6 = vor.u32 %v1993_v1, %v1564_v0  ;;  %v1943_v8 = vld [vmem:[#allocation5 + $0x14] sm:$0xf0] }
  0x27   :  { %756 = vmatpush.bf16.msra.mxu3 %v1581_v46  ;;  %v1492_v9 = vld [vmem:[#allocation5 + $0x110] sm:$0xf]  ;;  %v1437_v10 = vor.u32 %v1961_v3, %v1436_v2  ;;  %v1975_v11 = vld [vmem:[#allocation5 + $0x114] sm:$0xf0]  ;;  %v1365_v16 = vor.u32 %v1943_v8, %v1364_v7  ;;  %v1356_v17 = vld [vmem:[#allocation5] sm:$0xf] }
  0x28   :  { %730 = vmatpush.bf16.msra.mxu1 %v1453_v50  ;;  %v1556_v12 = vld [vmem:[#allocation5 + $0x190] sm:$0xf]  ;;  %v1991_v13 = vld [vmem:[#allocation5 + $0x194] sm:$0xf0]  ;;  %v1941_v18 = vld [vmem:[#allocation5 + $0x4] sm:$0xf0]  ;;  %v1493_v20 = vor.u32 %v1975_v11, %v1492_v9 }
  0x29   :  { %718 = vmatpush.bf16.msra.mxu0 %v1381_v56  ;;  %v1428_v14 = vld [vmem:[#allocation5 + $0x90] sm:$0xf]  ;;  %v1959_v15 = vld [vmem:[#allocation5 + $0x94] sm:$0xf0]  ;;  %v1484_v19 = vld [vmem:[#allocation5 + $0x100] sm:$0xf]  ;;  %v1557_v21 = vor.u32 %v1991_v13, %v1556_v12  ;;  %v1357_v32 = vor.u32 %v1941_v18, %v1356_v17 }
  0x2a   :  { %744 = vmatpush.bf16.msra.mxu2 %v1509_v57  ;;  %v1973_v22 = vld [vmem:[#allocation5 + $0x104] sm:$0xf0]  ;;  %v1548_v23 = vld [vmem:[#allocation5 + $0x180] sm:$0xf]  ;;  %v1429_v25 = vor.u32 %v1959_v15, %v1428_v14  ;;  %v1668_v26 = vld [vmem:[#allocation5 + $0x270] sm:$0xf] }
  0x2b   :  { %757 = vmatpush.bf16.msra.mxu3 %v1573_v58  ;;  %v1989_v24 = vld [vmem:[#allocation5 + $0x184] sm:$0xf0]  ;;  %v2019_v27 = vld [vmem:[#allocation5 + $0x274] sm:$0xf0]  ;;  %v1954_v28 = vld [vmem:[#allocation5 + $0x74] sm:$0xf]  ;;  %v1485_v36 = vor.u32 %v1973_v22, %v1484_v19 }
  0x2c   :  { %731 = vmatpush.bf16.msra.mxu1 %v1445_v62  ;;  %v1414_v29 = vld [vmem:[#allocation5 + $0x78] sm:$0xf0]  ;;  %v1420_v30 = vld [vmem:[#allocation5 + $0x80] sm:$0xf]  ;;  %v1957_v31 = vld [vmem:[#allocation5 + $0x84] sm:$0xf0]  ;;  %v1549_v37 = vor.u32 %v1989_v24, %v1548_v23  ;;  %v1669_v41 = vor.u32 %v2019_v27, %v1668_v26 }
  0x2d   :  { %719 = vmatpush.bf16.msra.mxu0 %v1373_v4  ;;  %v104_v33 = vld [vmem:[#allocation2 + $0x10] sm:$0xff]  ;;  %v1740_v34 = vld [vmem:[#allocation5 + $0x300] sm:$0xf]  ;;  %v2037_v35 = vld [vmem:[#allocation5 + $0x304] sm:$0xf0]  ;;  %v1417_v42 = vor.u32 %v1954_v28, %v1414_v29  ;;  %v1421_v46 = vor.u32 %v1957_v31, %v1420_v30  ;;  %vm710_vm0 = vcmask 130048  }
  0x2e   :  { %745 = vmatpush.bf16.msra.mxu2 %v1501_v5  ;;  %v1732_v38 = vld [vmem:[#allocation5 + $0x2f0] sm:$0xf]  ;;  %v2035_v39 = vld [vmem:[#allocation5 + $0x2f4] sm:$0xf0]  ;;  %v1970_v40 = vld [vmem:[#allocation5 + $0xf4] sm:$0xf]  ;;  %v1741_v47 = vor.u32 %v2037_v35, %v1740_v34  ;;  %v2318_v51 = vpack.c.bf16 %v104_v33, %v104_v33 }
  0x2f   :  { %758 = vmatpush.bf16.msra.mxu3 %v1565_v6  ;;  %v1478_v43 = vld [vmem:[#allocation5 + $0xf8] sm:$0xf0]  ;;  %v1660_v44 = vld [vmem:[#allocation5 + $0x260] sm:$0xf]  ;;  %v102_v45 = vld [vmem:[#allocation2] sm:$0xff]  ;;  %v1733_v52 = vor.u32 %v2035_v39, %v1732_v38  ;;  %s1342_s8 = sshll.u32 %s2368_s7, 4  ;;  %s1343_s8 = int_to_ptr.hbm [resolvable:$true] %s1342_s8 }
  0x30   :  { %732 = vmatpush.bf16.msra.mxu1 %v1437_v10  ;;  %v2017_v48 = vld [vmem:[#allocation5 + $0x264] sm:$0xf0]  ;;  %v1952_v49 = vld [vmem:[#allocation5 + $0x64] sm:$0xf]  ;;  %v1406_v50 = vld [vmem:[#allocation5 + $0x68] sm:$0xf0]  ;;  %v1481_v55 = vor.u32 %v1970_v40, %v1478_v43  ;;  %v2320_v58 = vpack.c.bf16 %v102_v45, %v102_v45 }
  0x31   :  { %720 = vmatpush.bf16.msra.mxu0 %v1365_v16  ;;  %v105_v53 = vld [vmem:[#allocation2 + $0x18] sm:$0xff]  ;;  %v103_v54 = vld [vmem:[#allocation2 + $0x8] sm:$0xff]  ;;  %v2033_v57 = vld [vmem:[#allocation5 + $0x2e4] sm:$0xf0]  ;;  %v1661_v59 = vor.u32 %v2017_v48, %v1660_v44  ;;  %v1409_v60 = vor.u32 %v1952_v49, %v1406_v50 }
  0x32   :  { %746 = vmatpush.bf16.msra.mxu2 %v1493_v20  ;;  %v1724_v56 = vld [vmem:[#allocation5 + $0x2e0] sm:$0xf]  ;;  %v1968_v61 = vld [vmem:[#allocation5 + $0xe4] sm:$0xf]  ;;  %v1470_v62 = vld [vmem:[#allocation5 + $0xe8] sm:$0xf0]  ;;  %v2322_v3 = vpack.c.bf16 %v105_v53, %v105_v53  ;;  %v2324_v4 = vpack.c.bf16 %v103_v54, %v103_v54 }
  0x33   :  { %759 = vmatpush.bf16.msra.mxu3 %v1557_v21  ;;  %v1652_v63 = vld [vmem:[#allocation5 + $0x250] sm:$0xf]  ;;  %v2015_v0 = vld [vmem:[#allocation5 + $0x254] sm:$0xf0]  ;;  %v1950_v1 = vld [vmem:[#allocation5 + $0x54] sm:$0xf]  ;;  %v1725_v5 = vor.u32 %v2033_v57, %v1724_v56  ;;  %v1473_v6 = vor.u32 %v1968_v61, %v1470_v62 }
  0x34   :  { %733 = vmatpush.bf16.msra.mxu1 %v1429_v25  ;;  %v1398_v2 = vld [vmem:[#allocation5 + $0x58] sm:$0xf0]  ;;  %v1716_v7 = vld [vmem:[#allocation5 + $0x2d0] sm:$0xf]  ;;  %v2031_v8 = vld [vmem:[#allocation5 + $0x2d4] sm:$0xf0]  ;;  %v1653_v9 = vor.u32 %v2015_v0, %v1652_v63 }
  0x35   :  { %721 = vmatpush.bf16.msra.mxu0 %v1357_v32  ;;  %v1401_v10 = vor.u32 %v1950_v1, %v1398_v2  ;;  %v1966_v11 = vld [vmem:[#allocation5 + $0xd4] sm:$0xf]  ;;  %v1462_v12 = vld [vmem:[#allocation5 + $0xd8] sm:$0xf0]  ;;  %v1644_v13 = vld [vmem:[#allocation5 + $0x240] sm:$0xf]  ;;  %v1717_v17 = vor.u32 %v2031_v8, %v1716_v7 }
  0x36   :  { %747 = vmatpush.bf16.msra.mxu2 %v1485_v36  ;;  %v2013_v14 = vld [vmem:[#allocation5 + $0x244] sm:$0xf0]  ;;  %v1948_v15 = vld [vmem:[#allocation5 + $0x44] sm:$0xf]  ;;  %v1390_v16 = vld [vmem:[#allocation5 + $0x48] sm:$0xf0]  ;;  %v1465_v18 = vor.u32 %v1966_v11, %v1462_v12 }
  0x37   :  { %760 = vmatpush.bf16.msra.mxu3 %v1549_v37  ;;  %v1708_v19 = vld [vmem:[#allocation5 + $0x2c0] sm:$0xf]  ;;  %v2029_v20 = vld [vmem:[#allocation5 + $0x2c4] sm:$0xf0]  ;;  %v1645_v21 = vor.u32 %v2013_v14, %v1644_v13  ;;  %v1393_v22 = vor.u32 %v1948_v15, %v1390_v16  ;;  %v1964_v23 = vld [vmem:[#allocation5 + $0xc4] sm:$0xf] }
  0x38   :  { %734 = vmatpush.bf16.msra.mxu1 %v1421_v46  ;;  %722 = vmatmul.bf16.vlgmr.msra.gmra.mxu0 %v2320_v58  ;;  %v1454_v24 = vld [vmem:[#allocation5 + $0xc8] sm:$0xf0]  ;;  %v1636_v25 = vld [vmem:[#allocation5 + $0x230] sm:$0xf]  ;;  %v2011_v26 = vld [vmem:[#allocation5 + $0x234] sm:$0xf0]  ;;  %v1709_v29 = vor.u32 %v2029_v20, %v1708_v19 }
  0x39   :  { %766 = vmatpush.bf16.msrb.mxu0 %v1669_v41  ;;  %748 = vmatmul.bf16.vlgmr.msra.gmra.mxu2 %v2318_v51  ;;  %v1946_v27 = vld [vmem:[#allocation5 + $0x34] sm:$0xf]  ;;  %v1382_v28 = vld [vmem:[#allocation5 + $0x38] sm:$0xf0]  ;;  %v1457_v30 = vor.u32 %v1964_v23, %v1454_v24  ;;  %v1700_v31 = vld [vmem:[#allocation5 + $0x2b0] sm:$0xf]  ;;  %v1637_v34 = vor.u32 %v2011_v26, %v1636_v25 }
  0x3a   :  { %799 = vmatpush.bf16.msrb.mxu2 %v1741_v47  ;;  %761 = vmatmul.bf16.vlgmr.msra.gmra.mxu3 %v2322_v3  ;;  %v2027_v32 = vld [vmem:[#allocation5 + $0x2b4] sm:$0xf0]  ;;  %v1385_v35 = vor.u32 %v1946_v27, %v1382_v28  ;;  %v1962_v36 = vld [vmem:[#allocation5 + $0xb4] sm:$0xf]  ;;  %v1446_v37 = vld [vmem:[#allocation5 + $0xb8] sm:$0xf0] }
  0x3b   :  { %805 = vmatpush.bf16.msrb.mxu3 %v1417_v42  ;;  %735 = vmatmul.bf16.vlgmr.msra.gmra.mxu1 %v2324_v4  ;;  %v108_v33 = vld [vmem:[#allocation2 + $0x30] sm:$0xff]  ;;  %v1628_v38 = vld [vmem:[#allocation5 + $0x220] sm:$0xf]  ;;  %v2009_v39 = vld [vmem:[#allocation5 + $0x224] sm:$0xf0]  ;;  %v1701_v42 = vor.u32 %v2027_v32, %v1700_v31  ;;  %v1449_v44 = vor.u32 %v1962_v36, %v1446_v37 }
  0x3c   :  { %779 = vmatpush.bf16.msrb.mxu1 %v1733_v52  ;;  %v1944_v40 = vld [vmem:[#allocation5 + $0x24] sm:$0xf]  ;;  %v1374_v41 = vld [vmem:[#allocation5 + $0x28] sm:$0xf0]  ;;  %v2330_v43 = vpack.c.bf16 %v108_v33, %v108_v33  ;;  %v1692_v45 = vld [vmem:[#allocation5 + $0x2a0] sm:$0xf]  ;;  %v1629_v47 = vor.u32 %v2009_v39, %v1628_v38 }
  0x3d   :  { %767 = vmatpush.bf16.msrb.mxu0 %v1661_v59  ;;  %v2025_v46 = vld [vmem:[#allocation5 + $0x2a4] sm:$0xf0]  ;;  %v1377_v48 = vor.u32 %v1944_v40, %v1374_v41  ;;  %v1960_v49 = vld [vmem:[#allocation5 + $0xa4] sm:$0xf]  ;;  %v1438_v50 = vld [vmem:[#allocation5 + $0xa8] sm:$0xf0] }
  0x3e   :  { %818 = vmatpush.bf16.msra.mxu2 %v1481_v55  ;;  %v1620_v52 = vld [vmem:[#allocation5 + $0x210] sm:$0xf]  ;;  %v2007_v53 = vld [vmem:[#allocation5 + $0x214] sm:$0xf0]  ;;  %v1942_v54 = vld [vmem:[#allocation5 + $0x14] sm:$0xf]  ;;  %v1693_v56 = vor.u32 %v2025_v46, %v1692_v45  ;;  %v1441_v57 = vor.u32 %v1960_v49, %v1438_v50 }
  0x3f   :  { %806 = vmatpush.bf16.msrb.mxu3 %v1409_v60  ;;  %v1366_v55 = vld [vmem:[#allocation5 + $0x18] sm:$0xf0]  ;;  %v1684_v59 = vld [vmem:[#allocation5 + $0x290] sm:$0xf]  ;;  %v2023_v60 = vld [vmem:[#allocation5 + $0x294] sm:$0xf0]  ;;  %v1621_v62 = vor.u32 %v2007_v53, %v1620_v52 }
  0x40   :  { %780 = vmatpush.bf16.msrb.mxu1 %v1725_v5  ;;  %v1958_v61 = vld [vmem:[#allocation5 + $0x94] sm:$0xf]  ;;  %v1369_v63 = vor.u32 %v1942_v54, %v1366_v55  ;;  %v1430_v0 = vld [vmem:[#allocation5 + $0x98] sm:$0xf0]  ;;  %v1612_v1 = vld [vmem:[#allocation5 + $0x200] sm:$0xf]  ;;  %v1685_v8 = vor.u32 %v2023_v60, %v1684_v59 }
  0x41   :  { %768 = vmatpush.bf16.msrb.mxu0 %v1653_v9  ;;  %v2005_v2 = vld [vmem:[#allocation5 + $0x204] sm:$0xf0]  ;;  %v1940_v5 = vld [vmem:[#allocation5 + $0x4] sm:$0xf]  ;;  %v1986_v7 = vld [vmem:[#allocation5 + $0x174] sm:$0xf]  ;;  %v1433_v12 = vor.u32 %v1958_v61, %v1430_v0 }
  0x42   :  { %819 = vmatpush.bf16.msra.mxu2 %v1473_v6  ;;  %v1358_v6 = vld [vmem:[#allocation5 + $0x8] sm:$0xf0]  ;;  %v1542_v9 = vld [vmem:[#allocation5 + $0x178] sm:$0xf0]  ;;  %v1676_v13 = vld [vmem:[#allocation5 + $0x280] sm:$0xf]  ;;  %v1613_v16 = vor.u32 %v2005_v2, %v1612_v1 }
  0x43   :  { %807 = vmatpush.bf16.msrb.mxu3 %v1401_v10  ;;  %v2018_v10 = vld [vmem:[#allocation5 + $0x274] sm:$0xf]  ;;  %v1670_v11 = vld [vmem:[#allocation5 + $0x278] sm:$0xf0]  ;;  %v2021_v14 = vld [vmem:[#allocation5 + $0x284] sm:$0xf0] }
  0x44   :  { %781 = vmatpush.bf16.msrb.mxu1 %v1717_v17  ;;  %v106_v15 = vld [vmem:[#allocation2 + $0x20] sm:$0xff]  ;;  %v1361_v17 = vor.u32 %v1940_v5, %v1358_v6  ;;  %v2002_v20 = vld [vmem:[#allocation5 + $0x1f4] sm:$0xf]  ;;  %v1606_v23 = vld [vmem:[#allocation5 + $0x1f8] sm:$0xf0]  ;;  %v1677_v26 = vor.u32 %v2021_v14, %v1676_v13 }
  0x45   :  { %769 = vmatpush.bf16.msrb.mxu0 %v1645_v21  ;;  %v1422_v19 = vld [vmem:[#allocation5 + $0x88] sm:$0xf0]  ;;  %v1545_v21 = vor.u32 %v1986_v7, %v1542_v9  ;;  %v2034_v24 = vld [vmem:[#allocation5 + $0x2f4] sm:$0xf]  ;;  %v1734_v25 = vld [vmem:[#allocation5 + $0x2f8] sm:$0xf0] }
  0x46   :  { %820 = vmatpush.bf16.msra.mxu2 %v1465_v18  ;;  %v1956_v18 = vld [vmem:[#allocation5 + $0x84] sm:$0xf]  ;;  %v107_v27 = vld [vmem:[#allocation2 + $0x28] sm:$0xff]  ;;  %v1662_v33 = vld [vmem:[#allocation5 + $0x268] sm:$0xf0] }
  0x47   :  { %808 = vmatpush.bf16.msrb.mxu3 %v1393_v22  ;;  %v1673_v22 = vor.u32 %v2018_v10, %v1670_v11  ;;  %v1984_v28 = vld [vmem:[#allocation5 + $0x164] sm:$0xf]  ;;  %v1425_v31 = vor.u32 %v1956_v18, %v1422_v19  ;;  %v2336_v37 = vpack.c.bf16 %v107_v27, %v107_v27  ;;  %v1598_v39 = vld [vmem:[#allocation5 + $0x1e8] sm:$0xf0]  ;;  %v1526_v45 = vld [vmem:[#allocation5 + $0x158] sm:$0xf0] }
  0x48   :  { %782 = vmatpush.bf16.msrb.mxu1 %v1709_v29  ;;  %v1534_v29 = vld [vmem:[#allocation5 + $0x168] sm:$0xf0]  ;;  %v2016_v32 = vld [vmem:[#allocation5 + $0x264] sm:$0xf]  ;;  %v2014_v46 = vld [vmem:[#allocation5 + $0x254] sm:$0xf] }
  0x49   :  { %770 = vmatpush.bf16.msrb.mxu0 %v1637_v34  ;;  %1746 = vmatmul.msk.bf16.vlgmr.msrb.gmra.mxu2 %vm710_vm0, %v2330_v43  ;;  %v1609_v34 = vor.u32 %v2002_v20, %v1606_v23  ;;  %v2000_v36 = vld [vmem:[#allocation5 + $0x1e4] sm:$0xf]  ;;  %v1537_v38 = vor.u32 %v1984_v28, %v1534_v29  ;;  %v1726_v41 = vld [vmem:[#allocation5 + $0x2e8] sm:$0xf0]  ;;  %v1998_v50 = vld [vmem:[#allocation5 + $0x1d4] sm:$0xf] }
  0x4a   :  { %821 = vmatpush.bf16.msra.mxu2 %v1457_v30  ;;  %v2334_v30 = vpack.c.bf16 %v106_v15, %v106_v15  ;;  %v2032_v40 = vld [vmem:[#allocation5 + $0x2e4] sm:$0xf]  ;;  %v1590_v53 = vld [vmem:[#allocation5 + $0x1d8] sm:$0xf0]  ;;  %v2030_v54 = vld [vmem:[#allocation5 + $0x2d4] sm:$0xf] }
  0x4b   :  { %809 = vmatpush.bf16.msrb.mxu3 %v1385_v35  ;;  %v1737_v35 = vor.u32 %v2034_v24, %v1734_v25  ;;  %v1729_v49 = vor.u32 %v2032_v40, %v1726_v41  ;;  %v1718_v55 = vld [vmem:[#allocation5 + $0x2d8] sm:$0xf0]  ;;  %v1518_v59 = vld [vmem:[#allocation5 + $0x148] sm:$0xf0]  ;;  %v2012_v60 = vld [vmem:[#allocation5 + $0x244] sm:$0xf] }
  0x4c   :  { %783 = vmatpush.bf16.msrb.mxu1 %v1701_v42  ;;  %v1665_v42 = vor.u32 %v2016_v32, %v1662_v33  ;;  %v1646_v61 = vld [vmem:[#allocation5 + $0x248] sm:$0xf0]  ;;  %v1996_v0 = vld [vmem:[#allocation5 + $0x1c4] sm:$0xf]  ;;  %v1510_v9 = vld [vmem:[#allocation5 + $0x138] sm:$0xf0] }
  0x4d   :  { %771 = vmatpush.bf16.msrb.mxu0 %v1629_v47  ;;  %v1654_v47 = vld [vmem:[#allocation5 + $0x258] sm:$0xf0]  ;;  %v1582_v2 = vld [vmem:[#allocation5 + $0x1c8] sm:$0xf0]  ;;  %v2028_v5 = vld [vmem:[#allocation5 + $0x2c4] sm:$0xf]  ;;  %v1649_v7 = vor.u32 %v2012_v60, %v1646_v61 }
  0x4e   :  { %822 = vmatpush.bf16.msra.mxu2 %v1449_v44  ;;  %v1982_v44 = vld [vmem:[#allocation5 + $0x154] sm:$0xf]  ;;  %v1710_v6 = vld [vmem:[#allocation5 + $0x2c8] sm:$0xf0]  ;;  %v1585_v11 = vor.u32 %v1996_v0, %v1582_v2  ;;  %v1574_v14 = vld [vmem:[#allocation5 + $0x1b8] sm:$0xf0] }
  0x4f   :  { %810 = vmatpush.bf16.msrb.mxu3 %v1377_v48  ;;  %v1601_v48 = vor.u32 %v2000_v36, %v1598_v39  ;;  %v1529_v52 = vor.u32 %v1982_v44, %v1526_v45  ;;  %v2010_v10 = vld [vmem:[#allocation5 + $0x234] sm:$0xf]  ;;  %v1976_v18 = vld [vmem:[#allocation5 + $0x124] sm:$0xf]  ;;  %v1502_v19 = vld [vmem:[#allocation5 + $0x128] sm:$0xf0] }
  0x50   :  { %784 = vmatpush.bf16.msrb.mxu1 %v1693_v56  ;;  %v1657_v56 = vor.u32 %v2014_v46, %v1654_v47  ;;  %v2026_v15 = vld [vmem:[#allocation5 + $0x2b4] sm:$0xf]  ;;  %v2008_v20 = vld [vmem:[#allocation5 + $0x224] sm:$0xf]  ;;  %v1505_v25 = vor.u32 %v1976_v18, %v1502_v19  ;;  %v1694_v28 = vld [vmem:[#allocation5 + $0x2a8] sm:$0xf0] }
  0x51   :  { %772 = vmatpush.bf16.msrb.mxu0 %v1621_v62  ;;  %v1593_v62 = vor.u32 %v1998_v50, %v1590_v53  ;;  %v1992_v24 = vld [vmem:[#allocation5 + $0x1a4] sm:$0xf]  ;;  %v1494_v32 = vld [vmem:[#allocation5 + $0x118] sm:$0xf0]  ;;  %v2006_v33 = vld [vmem:[#allocation5 + $0x214] sm:$0xf] }
  0x52   :  { %823 = vmatpush.bf16.msra.mxu2 %v1441_v57  ;;  %v1980_v57 = vld [vmem:[#allocation5 + $0x144] sm:$0xf]  ;;  %v1558_v40 = vld [vmem:[#allocation5 + $0x198] sm:$0xf0]  ;;  %v2022_v41 = vld [vmem:[#allocation5 + $0x294] sm:$0xf] }
  0x53   :  { %811 = vmatpush.bf16.msrb.mxu3 %v1369_v63  ;;  %v1721_v63 = vor.u32 %v2030_v54, %v1718_v55  ;;  %v1521_v1 = vor.u32 %v1980_v57, %v1518_v59  ;;  %v2024_v27 = vld [vmem:[#allocation5 + $0x2a4] sm:$0xf]  ;;  %v1486_v46 = vld [vmem:[#allocation5 + $0x108] sm:$0xf0] }
  0x54   :  { %785 = vmatpush.bf16.msrb.mxu1 %v1685_v8  ;;  %v1978_v8 = vld [vmem:[#allocation5 + $0x134] sm:$0xf]  ;;  %v1697_v36 = vor.u32 %v2024_v27, %v1694_v28  ;;  %v1972_v45 = vld [vmem:[#allocation5 + $0x104] sm:$0xf]  ;;  %v1742_v50 = vld [vmem:[#allocation5 + $0x308] sm:$0xf0] }
  0x55   :  { %773 = vmatpush.bf16.msrb.mxu0 %v1613_v16  ;;  %v1513_v13 = vor.u32 %v1978_v8, %v1510_v9  ;;  %v1702_v16 = vld [vmem:[#allocation5 + $0x2b8] sm:$0xf0]  ;;  %v2004_v47 = vld [vmem:[#allocation5 + $0x204] sm:$0xf]  ;;  %v1489_v54 = vor.u32 %v1972_v45, %v1486_v46  ;;  %v1678_v60 = vld [vmem:[#allocation5 + $0x288] sm:$0xf0] }
  0x56   :  { %824 = vmatpush.bf16.msra.mxu2 %v1433_v12  ;;  %v1994_v12 = vld [vmem:[#allocation5 + $0x1b4] sm:$0xf]  ;;  %v1705_v23 = vor.u32 %v2026_v15, %v1702_v16  ;;  %v1988_v55 = vld [vmem:[#allocation5 + $0x184] sm:$0xf]  ;;  %v2051_v9 = vld [vmem:[#allocation8 + $0x64] sm:$0xf0] }
  0x57   :  { %812 = vmatpush.bf16.msrb.mxu3 %v1361_v17  ;;  %v2020_v59 = vld [vmem:[#allocation5 + $0x284] sm:$0xf]  ;;  %v1798_v8 = vld [vmem:[#allocation8 + $0x60] sm:$0xf]  ;;  %v2046_v15 = vld [vmem:[#allocation8 + $0x44] sm:$0xf] }
  0x58   :  { %786 = vmatpush.bf16.msrb.mxu1 %v1677_v26  ;;  %774 = vmatmul.bf16.vlgmr.msrb.gmra.mxu0 %v2334_v30  ;;  %v1566_v26 = vld [vmem:[#allocation5 + $0x1a8] sm:$0xf0]  ;;  %v1806_v0 = vld [vmem:[#allocation8 + $0x70] sm:$0xf]  ;;  %v1784_v16 = vld [vmem:[#allocation8 + $0x48] sm:$0xf0] }
  0x59   :  { %831 = vmatpush.bf16.msra.mxu0 %v1545_v21  ;;  %v1630_v21 = vld [vmem:[#allocation5 + $0x228] sm:$0xf0]  ;;  %v1787_v18 = vor.u32 %v2046_v15, %v1784_v16  ;;  %v1774_v19 = vld [vmem:[#allocation8 + $0x30] sm:$0xf]  ;;  %v2042_v27 = vld [vmem:[#allocation8 + $0x24] sm:$0xf] }
  0x5a   :  { %825 = vmatpush.bf16.msra.mxu2 %v1425_v31  ;;  %813 = vmatmul.bf16.vlgmr.msrb.gmra.mxu3 %v2320_v58  ;;  %v1713_v58 = vor.u32 %v2028_v5, %v1710_v6  ;;  %v1633_v29 = vor.u32 %v2008_v20, %v1630_v21  ;;  %v1974_v31 = vld [vmem:[#allocation5 + $0x114] sm:$0xf]  ;;  %v2052_v5 = vld [vmem:[#allocation8 + $0x74] sm:$0xf]  ;;  %v1808_v6 = vld [vmem:[#allocation8 + $0x78] sm:$0xf0] }
  0x5b   :  { %857 = vmatpush.bf16.msra.mxu3 %v1673_v22  ;;  %787 = vmatmul.bf16.vlgmr.msrb.gmra.mxu1 %v2336_v37  ;;  %v1577_v22 = vor.u32 %v1994_v12, %v1574_v14  ;;  %v1497_v39 = vor.u32 %v1974_v31, %v1494_v32  ;;  %v1782_v12 = vld [vmem:[#allocation8 + $0x40] sm:$0xf]  ;;  %v2045_v20 = vld [vmem:[#allocation8 + $0x34] sm:$0xf0]  ;;  %v2044_v21 = vld [vmem:[#allocation8 + $0x34] sm:$0xf] }
  0x5c   :  { %844 = vmatpush.bf16.msra.mxu1 %v1609_v34  ;;  %v1622_v34 = vld [vmem:[#allocation5 + $0x218] sm:$0xf0]  ;;  %v1758_v32 = vld [vmem:[#allocation8 + $0x10] sm:$0xf] }
  0x5d   :  { %832 = vmatpush.bf16.msra.mxu0 %v1537_v38  ;;  %826 = vmatmul.bf16.vlgmr.msra.gmra.mxu2 %v2324_v4  ;;  %v1638_v4 = vld [vmem:[#allocation5 + $0x238] sm:$0xf0]  ;;  %v1990_v38 = vld [vmem:[#allocation5 + $0x194] sm:$0xf]  ;;  %v1625_v44 = vor.u32 %v2006_v33, %v1622_v34  ;;  %v2041_v33 = vld [vmem:[#allocation8 + $0x14] sm:$0xf0] }
  0x5e   :  { %870 = vmatpush.bf16.msrb.mxu2 %v1737_v35  ;;  %v1641_v17 = vor.u32 %v2010_v10, %v1638_v4  ;;  %v1569_v35 = vor.u32 %v1992_v24, %v1566_v26  ;;  %v2050_v10 = vld [vmem:[#allocation8 + $0x64] sm:$0xf]  ;;  %v2043_v26 = vld [vmem:[#allocation8 + $0x24] sm:$0xf0]  ;;  %v2040_v34 = vld [vmem:[#allocation8 + $0x14] sm:$0xf] }
  0x5f   :  { %858 = vmatpush.bf16.msra.mxu3 %v1665_v42  ;;  %v1686_v42 = vld [vmem:[#allocation5 + $0x298] sm:$0xf0] }
  0x60   :  { %845 = vmatpush.bf16.msra.mxu1 %v1601_v48  ;;  %v1614_v48 = vld [vmem:[#allocation5 + $0x208] sm:$0xf0]  ;;  %v1689_v53 = vor.u32 %v2022_v41, %v1686_v42  ;;  %v1750_v41 = vld [vmem:[#allocation8] sm:$0xf]  ;;  %v2039_v42 = vld [vmem:[#allocation8 + $0x4] sm:$0xf0] }
  0x61   :  { %833 = vmatpush.bf16.msra.mxu0 %v1529_v52  ;;  %v1561_v52 = vor.u32 %v1990_v38, %v1558_v40  ;;  %v1617_v57 = vor.u32 %v2004_v47, %v1614_v48  ;;  %v1751_v45 = vor.u32 %v2039_v42, %v1750_v41  ;;  %v1752_v46 = vld [vmem:[#allocation8 + $0x8] sm:$0xf0] }
  0x62   :  { %871 = vmatpush.bf16.msrb.mxu2 %v1729_v49  ;;  %v2036_v49 = vld [vmem:[#allocation5 + $0x304] sm:$0xf] }
  0x63   :  { %859 = vmatpush.bf16.msra.mxu3 %v1657_v56  ;;  %v1550_v56 = vld [vmem:[#allocation5 + $0x188] sm:$0xf0]  ;;  %v1745_v61 = vor.u32 %v2036_v49, %v1742_v50  ;;  %v2348_v49 = vld [vmem:[#allocation7] sm:$0x3] }
  0x64   :  { %846 = vmatpush.bf16.msra.mxu1 %v1593_v62  ;;  %v1553_v62 = vor.u32 %v1988_v55, %v1550_v56  ;;  %v2068_v55 = vld [vmem:[#allocation8 + $0xf4] sm:$0xf] }
  0x65   :  { %834 = vmatpush.bf16.msra.mxu0 %v1521_v1  ;;  %v2053_v1 = vld [vmem:[#allocation8 + $0x74] sm:$0xf0] }
  0x66   :  { %872 = vmatpush.bf16.msrb.mxu2 %v1721_v63  ;;  %v1681_v63 = vor.u32 %v2020_v59, %v1678_v60  ;;  %v1807_v2 = vor.u32 %v2053_v1, %v1806_v0  ;;  %v1872_v59 = vld [vmem:[#allocation8 + $0xf8] sm:$0xf0]  ;;  %v216_v60 = vperm.slane %v2348_v49, 0  ;;  %v2067_v0 = vld [vmem:[#allocation8 + $0xe4] sm:$0xf0] }
  0x67   :  { %860 = vmatpush.bf16.msra.mxu3 %v1649_v7  ;;  %v1811_v7 = vor.u32 %v2052_v5, %v1808_v6  ;;  %v2066_v1 = vld [vmem:[#allocation8 + $0xe4] sm:$0xf]  ;;  %v1864_v6 = vld [vmem:[#allocation8 + $0xe8] sm:$0xf0] }
  0x68   :  { %847 = vmatpush.bf16.msra.mxu1 %v1585_v11  ;;  %v2048_v11 = vld [vmem:[#allocation8 + $0x54] sm:$0xf] }
  0x69   :  { %835 = vmatpush.bf16.msra.mxu0 %v1513_v13  ;;  %v2047_v13 = vld [vmem:[#allocation8 + $0x44] sm:$0xf0] }
  0x6a   :  { %873 = vmatpush.bf16.msrb.mxu2 %v1713_v58  ;;  %v1792_v58 = vld [vmem:[#allocation8 + $0x58] sm:$0xf0] }
  0x6b   :  { %861 = vmatpush.bf16.msra.mxu3 %v1641_v17  ;;  %v1795_v14 = vor.u32 %v2048_v11, %v1792_v58  ;;  %v1783_v17 = vor.u32 %v2047_v13, %v1782_v12  ;;  %v1856_v11 = vld [vmem:[#allocation8 + $0xd8] sm:$0xf0]  ;;  %v1846_v12 = vld [vmem:[#allocation8 + $0xc0] sm:$0xf]  ;;  %v2063_v13 = vld [vmem:[#allocation8 + $0xc4] sm:$0xf0] }
  0x6c   :  { %848 = vmatpush.bf16.msra.mxu1 %v1577_v22  ;;  %v1776_v22 = vld [vmem:[#allocation8 + $0x38] sm:$0xf0]  ;;  %v1847_v16 = vor.u32 %v2063_v13, %v1846_v12 }
  0x6d   :  { %836 = vmatpush.bf16.msra.mxu0 %v1505_v25  ;;  %v1779_v24 = vor.u32 %v2044_v21, %v1776_v22  ;;  %v1766_v25 = vld [vmem:[#allocation8 + $0x20] sm:$0xf]  ;;  %v2077_v12 = vld [vmem:[#allocation10 + $0x38] sm:$0xff] }
  0x6e   :  { %874 = vmatpush.bf16.msrb.mxu2 %v1705_v23  ;;  %v1775_v23 = vor.u32 %v2045_v20, %v1774_v19  ;;  %v1767_v28 = vor.u32 %v2043_v26, %v1766_v25  ;;  %v2060_v25 = vld [vmem:[#allocation8 + $0xb4] sm:$0xf]  ;;  %v2085_v13 = vld [vmem:[#allocation10 + $0x78] sm:$0xff] }
  0x6f   :  { %862 = vmatpush.bf16.msra.mxu3 %v1633_v29  ;;  %v1768_v29 = vld [vmem:[#allocation8 + $0x28] sm:$0xf0] }
  0x70   :  { %849 = vmatpush.bf16.msra.mxu1 %v1569_v35  ;;  %v1771_v31 = vor.u32 %v2042_v27, %v1768_v29  ;;  %v1759_v35 = vor.u32 %v2041_v33, %v1758_v32  ;;  %v1840_v27 = vld [vmem:[#allocation8 + $0xb8] sm:$0xf0]  ;;  %v1830_v32 = vld [vmem:[#allocation8 + $0xa0] sm:$0xf]  ;;  %v2059_v33 = vld [vmem:[#allocation8 + $0xa4] sm:$0xf0] }
  0x71   :  { %837 = vmatpush.bf16.msra.mxu0 %v1497_v39  ;;  %v1843_v29 = vor.u32 %v2060_v25, %v1840_v27 }
  0x72   :  { %875 = vmatpush.bf16.msrb.mxu2 %v1697_v36  ;;  %v1760_v36 = vld [vmem:[#allocation8 + $0x18] sm:$0xf0] }
  0x73   :  { %863 = vmatpush.bf16.msra.mxu3 %v1625_v44  ;;  %v1763_v39 = vor.u32 %v2040_v34, %v1760_v36  ;;  %v2038_v44 = vld [vmem:[#allocation8 + $0x4] sm:$0xf] }
  0x74   :  { %850 = vmatpush.bf16.msra.mxu1 %v1561_v52  ;;  %v1755_v47 = vor.u32 %v2038_v44, %v1752_v46  ;;  %v2058_v36 = vld [vmem:[#allocation8 + $0xa4] sm:$0xf]  ;;  %v2057_v46 = vld [vmem:[#allocation8 + $0x94] sm:$0xf0] }
  0x75   :  { %838 = vmatpush.bf16.msra.mxu0 %v1489_v54  ;;  %v2069_v54 = vld [vmem:[#allocation8 + $0xf4] sm:$0xf0] }
  0x76   :  { %876 = vmatpush.bf16.msrb.mxu2 %v1689_v53  ;;  %v1870_v53 = vld [vmem:[#allocation8 + $0xf0] sm:$0xf] }
  0x77   :  { %864 = vmatpush.bf16.msra.mxu3 %v1617_v57  ;;  %v1871_v57 = vor.u32 %v2069_v54, %v1870_v53  ;;  %v1814_v53 = vld [vmem:[#allocation8 + $0x80] sm:$0xf]  ;;  %v2055_v54 = vld [vmem:[#allocation8 + $0x84] sm:$0xf0] }
  0x78   :  { %851 = vmatpush.bf16.msra.mxu1 %v1553_v62  ;;  %839 = vmatmul.bf16.vlgmr.msra.gmra.mxu0 %v2318_v51  ;;  %v1799_v51 = vor.u32 %v2051_v9, %v1798_v8  ;;  %v1867_v8 = vor.u32 %v2066_v1, %v1864_v6 }
  0x79   :  { %890 = vmatpush.bf16.msrb.mxu0 %v1745_v61  ;;  %v1875_v61 = vor.u32 %v2068_v55, %v1872_v59  ;;  %v2054_v55 = vld [vmem:[#allocation8 + $0x84] sm:$0xf] }
  0x7a   :  { %865 = vmatmul.bf16.vlgmr.msra.gmra.mxu3 %v2334_v30  ;;  %877 = vmatpush.bf16.msrb.mxu2 %v1681_v63  ;;  %v1800_v30 = vld [vmem:[#allocation8 + $0x68] sm:$0xf0]  ;;  %v1862_v63 = vld [vmem:[#allocation8 + $0xe0] sm:$0xf] }
  0x7b   :  { %852 = vmatmul.bf16.vlgmr.msra.gmra.mxu1 %v2322_v3  ;;  %v1803_v4 = vor.u32 %v2050_v10, %v1800_v30  ;;  %v1790_v3 = vld [vmem:[#allocation8 + $0x50] sm:$0xf]  ;;  %1111 = vmatpush.bf16.msrb.mxu3 %v1871_v57  ;;  %v1863_v5 = vor.u32 %v2067_v0, %v1862_v63  ;;  %v1816_v57 = vld [vmem:[#allocation8 + $0x88] sm:$0xf0] }
  0x7c   :  { %1098 = vmatpush.bf16.msrb.mxu1 %v1807_v2  ;;  %v1854_v30 = vld [vmem:[#allocation8 + $0xd0] sm:$0xf] }
  0x7d   :  { %878 = vmatmul.bf16.vlgmr.msrb.gmra.mxu2 %v2336_v37  ;;  %1124 = vmatpush.bf16.msra.mxu0 %v1811_v7  ;;  %v2049_v37 = vld [vmem:[#allocation8 + $0x54] sm:$0xf0] }
  0x7e   :  { %1137 = vmatpush.bf16.msra.mxu2 %v1875_v61 }
  0x7f   :  { %1112 = vmatpush.bf16.msrb.mxu3 %v1863_v5 }
  0x80   :  { %1099 = vmatpush.bf16.msrb.mxu1 %v1799_v51 }
  0x81   :  { %1125 = vmatpush.bf16.msra.mxu0 %v1803_v4  ;;  %v2065_v4 = vld [vmem:[#allocation8 + $0xd4] sm:$0xf0] }
  0x82   :  { %1138 = vmatpush.bf16.msra.mxu2 %v1867_v8 }
  0x85   :  { %1126 = vmatpush.bf16.msra.mxu0 %v1795_v14  ;;  %v2062_v14 = vld [vmem:[#allocation8 + $0xc4] sm:$0xf] }
  0x88   :  { %1747 = vmatmul.msk.bf16.vlgmr.msrb.gmra.mxu0 %vm710_vm0, %v2330_v43  ;;  %v1791_v43 = vor.u32 %v2049_v37, %v1790_v3  ;;  %v2064_v3 = vld [vmem:[#allocation8 + $0xd4] sm:$0xf]  ;;  %v1855_v37 = vor.u32 %v2065_v4, %v1854_v30 }
  0x89   :  { %1127 = vmatpush.bf16.msra.mxu0 %v1787_v18 }
  0x8a   :  { %1100 = vmatpush.bf16.msrb.mxu1 %v1791_v43  ;;  %v1859_v43 = vor.u32 %v2064_v3, %v1856_v11  ;;  %1113 = vmatpush.bf16.msrb.mxu3 %v1855_v37 }
  0x8c   :  { %1139 = vmatpush.bf16.msra.mxu2 %v1859_v43 }
  0x8d   :  { %1128 = vmatpush.bf16.msra.mxu0 %v1779_v24  ;;  %v2061_v24 = vld [vmem:[#allocation8 + $0xb4] sm:$0xf0] }
  0x8e   :  { %1101 = vmatpush.bf16.msrb.mxu1 %v1783_v17  ;;  %v1848_v17 = vld [vmem:[#allocation8 + $0xc8] sm:$0xf0]  ;;  %1114 = vmatpush.bf16.msrb.mxu3 %v1847_v16 }
  0x8f   :  { %v1851_v20 = vor.u32 %v2062_v14, %v1848_v17  ;;  %v2076_v14 = vld [vmem:[#allocation10 + $0x30] sm:$0xff]  ;;  %v2075_v16 = vld [vmem:[#allocation10 + $0x28] sm:$0xff] }
  0x90   :  { %v2083_v17 = vld [vmem:[#allocation10 + $0x68] sm:$0xff] }
  0x91   :  { %1129 = vmatpush.bf16.msra.mxu0 %v1771_v31  ;;  %1140 = vmatpush.bf16.msra.mxu2 %v1851_v20  ;;  %v2073_v20 = vld [vmem:[#allocation10 + $0x18] sm:$0xff] }
  0x92   :  { %1102 = vmatpush.bf16.msrb.mxu1 %v1775_v23  ;;  %v1838_v23 = vld [vmem:[#allocation8 + $0xb0] sm:$0xf] }
  0x93   :  { %v1839_v26 = vor.u32 %v2061_v24, %v1838_v23  ;;  %v2080_v23 = vld [vmem:[#allocation10 + $0x50] sm:$0xff] }
  0x95   :  { %1130 = vmatpush.bf16.msra.mxu0 %v1763_v39  ;;  %1115 = vmatpush.bf16.msrb.mxu3 %v1839_v26 }
  0x96   :  { %1103 = vmatpush.bf16.msrb.mxu1 %v1767_v28  ;;  %1141 = vmatpush.bf16.msra.mxu2 %v1843_v29  ;;  %v2079_v29 = vld [vmem:[#allocation10 + $0x48] sm:$0xff] }
  0x99   :  { %1131 = vmatpush.bf16.msra.mxu0 %v1755_v47  ;;  %v2056_v47 = vld [vmem:[#allocation8 + $0x94] sm:$0xf] }
  0x9a   :  { %1104 = vmatpush.bf16.msrb.mxu1 %v1759_v35  ;;  %v1831_v35 = vor.u32 %v2059_v33, %v1830_v32  ;;  %v2078_v32 = vld [vmem:[#allocation10 + $0x40] sm:$0xff]  ;;  %v932_v33 = vld [vmem:[%s2365_s4] sm:$0x3]  ;;  %s2262_s4 = smov [#allocation11]  }
  0x9c   :  { %1116 = vmatpush.bf16.msrb.mxu3 %v1831_v35  ;;  %v935_v35 = vperm.slane %v932_v33, 1 }
  0x9e   :  { %1105 = vmatpush.bf16.msrb.mxu1 %v1751_v45  ;;  %v1822_v45 = vld [vmem:[#allocation8 + $0x90] sm:$0xf] }
  0xa2   :  { %1286 = vmatpush.bf16.msra.mxu1 %v2077_v12 }
  0xa6   :  { %1287 = vmatpush.bf16.msra.mxu1 %v2076_v14 }
  0xaa   :  { %1288 = vmatpush.bf16.msra.mxu1 %v2075_v16 }
  0xb5   :  { %v723_v38 = vpop.f32.mrf.mxu0 }
  0xb6   :  { %v724_v2 = vadd.f32 %v723_v38, %v216_v60  ;;  %v1832_v38 = vld [vmem:[#allocation8 + $0xa8] sm:$0xf0]  ;;  %v1819_v60 = vor.u32 %v2054_v55, %v1816_v57 }
  0xb7   :  { %v1835_v41 = vor.u32 %v2058_v36, %v1832_v38 }
  0xb8   :  { %v736_v40 = vpop.f32.mrf.mxu1 }
  0xb9   :  { %v737_v9 = vadd.f32 %v736_v40, %v724_v2  ;;  %1142 = vmatpush.bf16.msra.mxu2 %v1835_v41 }
  0xbc   :  { %v749_v48 = vpop.f32.mrf.mxu2 }
  0xbd   :  { %v762_v50 = vpop.f32.mrf.mxu3  ;;  %v725_v52 = vpop.f32.mrf.mxu0  ;;  %v750_v51 = vadd.f32 %v749_v48, %v737_v9  ;;  %v1823_v48 = vor.u32 %v2057_v46, %v1822_v45 }
  0xbf   :  { %v763_v58 = vadd.f32 %v762_v50, %v750_v51  ;;  %v1824_v50 = vld [vmem:[#allocation8 + $0x98] sm:$0xf0]  ;;  %1117 = vmatpush.bf16.msrb.mxu3 %v1823_v48 }
  0xc0   :  { %v738_v56 = vpop.f32.mrf.mxu1  ;;  %v1827_v52 = vor.u32 %v2056_v47, %v1824_v50 }
  0xc1   :  { %v1815_v56 = vor.u32 %v2055_v54, %v1814_v53  ;;  %v2096_v53 = vld [vmem:[%s2367_s6] ss:$0 sm:$0xff]  ;;  %s1340_s6 = sshll.u32 %s2262_s4, 4  ;;  %s1341_s6 = int_to_ptr.vmem [resolvable:$true] %s1340_s6 }
  0xc2   :  { %1143 = vmatpush.bf16.msra.mxu2 %v1827_v52 }
  0xc3   :  { %1118 = vmatpush.bf16.msrb.mxu3 %v1815_v56 }
  0xc4   :  { %v751_v62 = vpop.f32.mrf.mxu2 }
  0xc5   :  { %v764_v7 = vpop.f32.mrf.mxu3  ;;  %v217_v62 = vperm.slane %v2348_v49, 1 }
  0xc6   :  { %1144 = vmatpush.bf16.msra.mxu2 %v1819_v60 }
  0xc7   :  { %1299 = vmatpush.bf16.msra.mxu3 %v2085_v13 }
  0xcc   :  { %v801_v10 = vpop.f32.mrf.mxu2 }
  0xd4   :  { %v803_v19 = vpop.f32.mrf.mxu2 }
  0xd5   :  { %v775_v15 = vpop.f32.mrf.mxu0  ;;  %v2082_v19 = vld [vmem:[#allocation10 + $0x60] sm:$0xff] }
  0xd6   :  { %v776_v18 = vadd.f32 %v775_v15, %v763_v58  ;;  %v2084_v15 = vld [vmem:[#allocation10 + $0x70] sm:$0xff] }
  0xd7   :  { %1300 = vmatpush.bf16.msra.mxu3 %v2084_v15 }
  0xd8   :  { %v788_v21 = vpop.f32.mrf.mxu1 }
  0xd9   :  { %v789_v22 = vadd.f32 %v788_v21, %v776_v18  ;;  %v2074_v18 = vld [vmem:[#allocation10 + $0x20] sm:$0xff]  ;;  %v2081_v21 = vld [vmem:[#allocation10 + $0x58] sm:$0xff] }
  0xda   :  { %1289 = vmatpush.bf16.msra.mxu1 %v2074_v18 }
  0xdb   :  { %v802_v28 = vadd.f32 %v801_v10, %v789_v22  ;;  %1301 = vmatpush.bf16.msra.mxu3 %v2083_v17  ;;  %v2072_v22 = vld [vmem:[#allocation10 + $0x10] sm:$0xff] }
  0xdd   :  { %v896_v31 = vmax.f32 %v802_v28, 0.0  ;;  %v777_v34 = vpop.f32.mrf.mxu0  ;;  %v814_v42 = vpop.f32.mrf.mxu3  ;;  %v2071_v28 = vld [vmem:[#allocation10 + $0x8] sm:$0xff] }
  0xde   :  { %v815_v63 = vadd.f32 %v814_v42, %v217_v62  ;;  %1290 = vmatpush.bf16.msra.mxu1 %v2073_v20  ;;  %v934_v34 = vperm.slane %v932_v33, 0 }
  0xdf   :  { %v898_v39 = vpack.c.bf16 %v896_v31, %v896_v31  ;;  %1302 = vmatpush.bf16.msra.mxu3 %v2082_v19  ;;  %v2070_v31 = vld [vmem:[#allocation10] sm:$0xff] }
  0xe0   :  { %v827_v40 = vpop.f32.mrf.mxu2  ;;  %v790_v44 = vpop.f32.mrf.mxu1 }
  0xe1   :  { %1106 = vmatmul.bf16.vlgmr.msrb.gmra.mxu1 %v898_v39  ;;  %1132 = vmatmul.bf16.vlgmr.msra.gmra.mxu0 %v898_v39  ;;  %v828_v1 = vadd.f32 %v827_v40, %v815_v63 }
  0xe2   :  { %1291 = vmatpush.bf16.msra.mxu1 %v2072_v22 }
  0xe3   :  { %1303 = vmatpush.bf16.msra.mxu3 %v2081_v21 }
  0xe5   :  { %v816_v61 = vpop.f32.mrf.mxu3 }
  0xe6   :  { %1292 = vmatpush.bf16.msra.mxu1 %v2071_v28 }
  0xe7   :  { %1304 = vmatpush.bf16.msra.mxu3 %v2080_v23 }
  0xe8   :  { %v829_v59 = vpop.f32.mrf.mxu2 }
  0xea   :  { %1293 = vmatpush.bf16.msra.mxu1 %v2070_v31 }
  0xeb   :  { %1305 = vmatpush.bf16.msra.mxu3 %v2079_v29 }
  0xef   :  { %1306 = vmatpush.bf16.msra.mxu3 %v2078_v32 }
  0xf5   :  { %v840_v0 = vpop.f32.mrf.mxu0 }
  0xf6   :  { %v841_v5 = vadd.f32 %v840_v0, %v828_v1 }
  0xf8   :  { %v853_v2 = vpop.f32.mrf.mxu1 }
  0xf9   :  { %v854_v8 = vadd.f32 %v853_v2, %v841_v5 }
  0xfd   :  { %v866_v6 = vpop.f32.mrf.mxu3  ;;  %v842_v7 = vpop.f32.mrf.mxu0 }
  0xfe   :  { %v867_v10 = vadd.f32 %v866_v6, %v854_v8 }
 0x100   :  { %v879_v9 = vpop.f32.mrf.mxu2  ;;  %v855_v51 = vpop.f32.mrf.mxu1 }
 0x101   :  { %v880_v30 = vadd.f32 %v879_v9, %v867_v10 }
 0x105   :  { %v868_v4 = vpop.f32.mrf.mxu3  ;;  %v892_v3 = vpop.f32.mrf.mxu0 }
 0x106   :  { %v893_v37 = vadd.f32 %v892_v3, %v880_v30 }
 0x108   :  { %v881_v11 = vpop.f32.mrf.mxu2  ;;  %v897_v43 = vmax.f32 %v893_v37, 0.0 }
 0x10a   :  { %v899_v58 = vpack.c.bf16 %v897_v43, %v897_v43 }
 0x10c   :  { %1119 = vmatmul.bf16.vlgmr.msrb.gmra.mxu3 %v899_v58  ;;  %1145 = vmatmul.bf16.vlgmr.msra.gmra.mxu2 %v899_v58 }
 0x10d   :  { %v894_v49 = vpop.f32.mrf.mxu0 }
 0x15e   :  { %v1107_v24 = vpop.f32.mrf.mxu1  ;;  %v1133_v25 = vpop.f32.mrf.mxu0 }
 0x15f   :  { %v1108_v36 = vadd.f32 %v1107_v24, %v934_v34  ;;  %v1134_v38 = vadd.f32 %v1133_v25, %v935_v35 }
 0x166   :  { %v1109_v26 = vpop.f32.mrf.mxu1  ;;  %v1135_v27 = vpop.f32.mrf.mxu0 }
 0x18f   :  { %v1120_v39 = vpop.f32.mrf.mxu3  ;;  %v1146_v40 = vpop.f32.mrf.mxu2 }
 0x190   :  { %v1121_v41 = vadd.f32 %v1120_v39, %v1108_v36  ;;  %v1147_v42 = vadd.f32 %v1146_v40, %v1134_v38 }
 0x192   :  { %v1150_v44 = vmax.f32 %v1121_v41, 0.0  ;;  %v1151_v45 = vmax.f32 %v1147_v42, 0.0 }
 0x194   :  { %v1152_v46 = vpack.c.bf16 %v1150_v44, %v1150_v44  ;;  %v1153_v47 = vpack.c.bf16 %v1151_v45, %v1151_v45 }
 0x196   :  { %1294 = vmatmul.bf16.vlgmr.msra.gmra.mxu1 %v1152_v46  ;;  %1307 = vmatmul.bf16.vlgmr.msra.gmra.mxu3 %v1153_v47 }
 0x197   :  { %v1122_v48 = vpop.f32.mrf.mxu3  ;;  %v1148_v50 = vpop.f32.mrf.mxu2 }
 0x213   :  { %v1295_v52 = vpop.f32.mrf.mxu1 }
 0x214   :  { %v1296_v54 = vadd.f32 %v2096_v53, %v1295_v52 }
 0x219   :  { %v1308_v55 = vpop.f32.mrf.mxu3 }
 0x21a   :  { %v1309_v56 = vadd.f32 %v1308_v55, %v1296_v54 }
 0x21b   :  { %v1297_v57 = vpop.f32.mrf.mxu1 }
 0x21c   :  { %1312 = vmax.xlane.f32.xlu0 %v1309_v56 }
 0x221   :  { %v1310_v59 = vpop.f32.mrf.mxu3 }
 0x28f   :  { %v1313_v60 = vpop.xlane.xlu0 %1312 }
 0x290   :  { %v1314_v61 = vsub.f32 %v1309_v56, %v1313_v60 }
 0x292   :  { %v1315_v62 = vmul.f32 1.442695, %v1314_v61 }
 0x294   :  { %2097 = vpow2.f32 %v1315_v62 }
 0x29a   :  { %v2098_v63 = vpop.eup %2097 }
 0x29b   :  { %1317 = vadd.xlane.f32.xlu0 %v2098_v63 }
 0x30e   :  { %v1318_v0 = vpop.xlane.xlu0 %1317 }
 0x30f   :  { %2099 = vrcp.f32 %v1318_v0  ;;  %v1330_v6 = vand.u32 2147483648, %v1318_v0  ;;  %v1328_v8 = vand.u32 2147483647, %v1318_v0  ;;  %vm1324_vm2 = vweird.f32 %v1318_v0 }
 0x311   :  { %v1331_v10 = vor.u32 1.1754944e-38, %v1330_v6  ;;  %vm1329_vm4 = vcmp.eq.f32.partialorder %v1328_v8, 8.507059e+37 }
 0x315   :  { %v2100_v1 = vpop.eup %2099 }
 0x316   :  { %v1320_v2 = vmul.f32 %v2100_v1, %v1318_v0  ;;  %vm1325_vm1 = vweird.f32 %v2100_v1 }
 0x317   :  { %vm1326_vm3 = vmor %vm1324_vm2, %vm1325_vm1 }
 0x318   :  { %v1321_v5 = vsub.f32 1.0, %v1320_v2 }
 0x31a   :  { %v1322_v7 = vmul.f32 %v2100_v1, %v1321_v5 }
 0x31c   :  { %v1323_v9 = vadd.f32 %v2100_v1, %v1322_v7 }
 0x31e   :  { %v1327_v51 = vsel %vm1326_vm3, %v2100_v1, %v1323_v9 }
 0x31f   :  { %v1332_v30 = vsel %vm1329_vm4, %v1331_v10, %v1327_v51 }
 0x320   :  { %v1333_v4 = vmul.f32 %v2098_v63, %v1332_v30 }
 0x322   :  { %1334 = vst [vmem:[#allocation11] sm:$0xff] %v1333_v4 }
 0x323   :  { %1345 = dma.vmem_to_hbm [thread:$0]  %s1341_s6, 128, %s1343_s8, [#allocation4]  }
 0x324   :  { %2251 = dma.done.wait [#allocation4], 128  }
 0x325   :  { %2252 = vsyncadd [#allocation4], 4294967168 }
 0x326   :  { %1350 = vsyncpa [#allocation3], 1 }
 0x327   :  { %1351 = vsyncpa [#allocation6], 1 }
 0x328   :  { %1352 = vsyncpa [#allocation9], 1 }
 0x329   :  { %1353 = vsyncpa [#allocation4], 1 }

</bundles_post_ra>
